<compile_context>
chip_gen: v6e
topology: v6e:2x2x1
jax: 0.10.0
libtpu: 0.0.40
codegen_flags: <defaults>
</compile_context>

<pallas_src>
import functools
import math

import jax
import jax.numpy as jnp
from jax.experimental import pallas as pl
from jax.experimental.pallas import tpu as pltpu

EPS = 1e-5  # nn.LayerNorm default


def _round_up(x: int, m: int) -> int:
    return ((x + m - 1) // m) * m


# --------------------------------------------------------------------------
# Kernel
# --------------------------------------------------------------------------
def _residual_mlp_kernel(
    x_ref,      # (tm, dim_p)      input token tile
    vec_ref,    # (8, dim_p)       rows: g1, be1, b1, g2, be2, b2, 0, 0  (f32)
    w1_ref,     # (dim_p, dim_p)   Linear1 weight, (in x out), bf16, zero-pad
    w2_ref,     # (dim_p, dim_p)   Linear2 weight, (in x out), bf16, zero-pad
    o_ref,      # (tm, dim_p)      output token tile
    *,
    dim_real,   # static: number of real (unpadded) features
    chunk,      # static: row sub-chunk size (128 or 256)
):
    tm, dim_p = x_ref.shape
    inv_n = jnp.float32(1.0 / dim_real)
    need_mask = dim_real != dim_p
    if need_mask:
        lane = jax.lax.broadcasted_iota(jnp.int32, (1, dim_p), 1)
        mask = lane < dim_real

    # Hoist the (1, dim_p) parameter rows out of the chunk loop (static
    # slices on the VMEM ref, loaded once).
    g1 = vec_ref[0:1, :]
    be1 = vec_ref[1:2, :]
    b1 = vec_ref[2:3, :]
    g2 = vec_ref[3:4, :]
    be2 = vec_ref[4:5, :]
    b2 = vec_ref[5:6, :]

    n_chunks = tm // chunk
    # Static Python loop: chunks are fully independent, so the VLIW scheduler
    # can overlap chunk k's MXU matmuls with chunk k±1's VPU/EUP LN / SiLU.
    for c in range(n_chunks):
        rows = pl.ds(c * chunk, chunk)
        x = x_ref[rows, :].astype(jnp.float32)

        # --- LayerNorm 1 (biased variance, reductions over the real dim) ---
        mu = jnp.sum(x, axis=-1, keepdims=True) * inv_n
        xc = x - mu
        if need_mask:
            xc = jnp.where(mask, xc, 0.0)
        var = jnp.sum(xc * xc, axis=-1, keepdims=True) * inv_n
        h = xc * jax.lax.rsqrt(var + EPS) * g1 + be1

        # --- Linear 1: bf16 operands on the MXU, f32 accumulation ---
        h = jnp.dot(h.astype(jnp.bfloat16), w1_ref[...],
                    preferred_element_type=jnp.float32) + b1

        # --- SiLU (f32; sigmoid on the EUP) ---
        h = h * jax.nn.sigmoid(h)

        # --- LayerNorm 2 (padded columns of h are exactly 0) ---
        mu2 = jnp.sum(h, axis=-1, keepdims=True) * inv_n
        hc = h - mu2
        if need_mask:
            hc = jnp.where(mask, hc, 0.0)
        var2 = jnp.sum(hc * hc, axis=-1, keepdims=True) * inv_n
        h = hc * jax.lax.rsqrt(var2 + EPS) * g2 + be2

        # --- Linear 2 ---
        h = jnp.dot(h.astype(jnp.bfloat16), w2_ref[...],
                    preferred_element_type=jnp.float32) + b2

        # --- Residual: re-read the input chunk from VMEM (short live range) ---
        o_ref[rows, :] = (h + x_ref[rows, :].astype(jnp.float32)).astype(o_ref.dtype)


# --------------------------------------------------------------------------
# Tiling heuristics
# --------------------------------------------------------------------------
@functools.lru_cache(maxsize=1)
def _vmem_limit_bytes() -> int:
    """Per-generation VMEM limit: ~3/4 of physical, capped at 96 MiB.
    v5e/v6e (128 MiB) -> 96 MiB; v7x (64 MiB per TC) -> 48 MiB."""
    try:
        cap = int(getattr(pltpu.get_tpu_info(), "vmem_capacity_bytes", 64 << 20))
    except Exception:
        cap = 64 << 20
    return min(96 << 20, (cap * 3) // 4)


def _choose_tm(m_rows: int, dim_p: int, x_itemsize: int, budget: int) -> int:
    """Token-tile height (multiple of 128) from a VMEM budget."""
    # Resident, single-buffered operands.
    weight_bytes = 2 * dim_p * dim_p * 2          # two bf16 (dim_p, dim_p) weights
    vec_bytes = 8 * dim_p * 4                     # packed LN/bias vectors (f32)
    # Per-row: in+out blocks double-buffered + ~4 f32 temporaries + 2 bf16 casts.
    per_row = 2 * 2 * dim_p * x_itemsize + 4 * 4 * dim_p + 2 * 2 * dim_p
    avail = budget - weight_bytes - vec_bytes
    if avail <= 0:
        # TODO(synk): needs the K/N weight-tiling axis (see header) to fit.
        raise ValueError(
            f"dim_p={dim_p}: resident weights ({weight_bytes} B) exceed the "
            f"VMEM budget ({budget} B); weight tiling not implemented yet.")

    tm = (avail // per_row) // 128 * 128
    m_up = _round_up(m_rows, 128)
    if m_up >= 256:
        # Keep >= 2 grid steps so the 'parallel' axis splits across the two
        # v7x TensorCores (near-free on single-TC chips).
        tm = min(tm, _round_up(pl.cdiv(m_rows, 2), 128))
    tm = min(tm, m_up, 1024)                      # 512-1024 is on the roofline plateau
    tm = max(tm, min(m_up, 256), 128)             # floor: tall-M tiles for MXU fill
    return tm


# --------------------------------------------------------------------------
# pallas_call wrapper
# --------------------------------------------------------------------------
@functools.partial(jax.jit, static_argnames=("tm", "vmem_limit"))
def _residual_mlp_impl(x, vecs, w1, w2, *, tm, vmem_limit):
    orig_shape = x.shape
    dim = x.shape[-1]
    dim_p = w1.shape[0]

    x2d = x.reshape(-1, dim)
    M = x2d.shape[0]
    if dim_p != dim:
        # Feature axis only; the token axis stays unpadded (ragged last block).
        x2d = jnp.pad(x2d, ((0, 0), (0, dim_p - dim)))

    chunk = 256 if tm % 256 == 0 else 128
    kernel = functools.partial(_residual_mlp_kernel, dim_real=dim, chunk=chunk)

    tok_spec = pl.BlockSpec((tm, dim_p), lambda i: (i, 0))
    vec_spec = pl.BlockSpec((8, dim_p), lambda i: (0, 0),
                            pipeline_mode=pl.Buffered(1))
    mat_spec = pl.BlockSpec((dim_p, dim_p), lambda i: (0, 0),
                            pipeline_mode=pl.Buffered(1))

    out = pl.pallas_call(
        kernel,
        out_shape=jax.ShapeDtypeStruct((M, dim_p), x.dtype),
        grid_spec=pltpu.PrefetchScalarGridSpec(
            num_scalar_prefetch=0,
            grid=(pl.cdiv(M, tm),),
            in_specs=[tok_spec, vec_spec, mat_spec, mat_spec],
            out_specs=tok_spec,
        ),
        compiler_params=pltpu.CompilerParams(
            dimension_semantics=("parallel",),
            vmem_limit_bytes=vmem_limit,
        ),
    )(x2d, vecs, w1, w2)

    if dim_p != dim:
        out = out[:, :dim]
    return out.reshape(orig_shape)


def residual_mlp_block(x, prepared):
    """x: (..., dim). prepared: output of prepare_params()."""
    dim_p = prepared["w1"].shape[0]
    M = math.prod(x.shape[:-1])
    vmem_limit = _vmem_limit_bytes()
    # Leave ~15% of the limit for Mosaic-internal scratch / bookkeeping.
    tm = _choose_tm(M, dim_p, jnp.dtype(x.dtype).itemsize, int(vmem_limit * 0.85))
    return _residual_mlp_impl(x, prepared["vecs"], prepared["w1"],
                              prepared["w2"], tm=tm, vmem_limit=vmem_limit)


# --------------------------------------------------------------------------
# Parameters
# --------------------------------------------------------------------------
def init_params(key, dim, dtype=jnp.float32):
    """Deterministic synthetic init matching the nn.Module parameter shapes."""
    k1, k2, k3, k4 = jax.random.split(key, 4)
    bound = 1.0 / (dim ** 0.5)
    return {
        "ln1_w": jnp.ones((dim,), dtype),
        "ln1_b": jnp.zeros((dim,), dtype),
        "lin1_w": jax.random.uniform(k1, (dim, dim), dtype, -bound, bound),
        "lin1_b": jax.random.uniform(k2, (dim,), dtype, -bound, bound),
        "ln2_w": jnp.ones((dim,), dtype),
        "ln2_b": jnp.zeros((dim,), dtype),
        "lin2_w": jax.random.uniform(k3, (dim, dim), dtype, -bound, bound),
        "lin2_b": jax.random.uniform(k4, (dim,), dtype, -bound, bound),
    }


def prepare_params(params, *, weight_dtype=jnp.bfloat16):
    """One-time packaging: pad the feature dim to a multiple of 128
    (lane-dense), transpose Linear weights to (in, out) so the kernel computes
    x @ W (== PyTorch x @ W.T), cast weights to bf16, and pack the six LN/bias
    vectors into one (8, dim_p) f32 operand. All padding is ZERO (load-bearing:
    keeps padded feature columns exactly 0 through the whole kernel)."""
    dim = params["lin1_w"].shape[0]
    dim_p = _round_up(dim, 128)
    pad = dim_p - dim

    def vec(v):
        return jnp.pad(v.astype(jnp.float32), (0, pad))

    def mat(w):
        return jnp.pad(w.T.astype(jnp.float32), ((0, pad), (0, pad))).astype(weight_dtype)

    zeros = jnp.zeros((dim_p,), jnp.float32)
    vecs = jnp.stack([
        vec(params["ln1_w"]), vec(params["ln1_b"]), vec(params["lin1_b"]),
        vec(params["ln2_w"]), vec(params["ln2_b"]), vec(params["lin2_b"]),
        zeros, zeros,
    ])  # (8, dim_p)

    return {"vecs": vecs, "w1": mat(params["lin1_w"]), "w2": mat(params["lin2_w"])}


# --------------------------------------------------------------------------
# Reference + test
# --------------------------------------------------------------------------
def _reference(x, p):
    """Pure-JAX (f32) reference of the PyTorch forward."""
    def ln(v, w, b):
        mu = jnp.mean(v, axis=-1, keepdims=True)
        var = jnp.mean(jnp.square(v - mu), axis=-1, keepdims=True)
        return (v - mu) * jax.lax.rsqrt(var + EPS) * w + b

    res = x
    h = ln(x, p["ln1_w"], p["ln1_b"])
    h = h @ p["lin1_w"].T + p["lin1_b"]
    h = h * jax.nn.sigmoid(h)
    h = ln(h, p["ln2_w"], p["ln2_b"])
    h = h @ p["lin2_w"].T + p["lin2_b"]
    return h + res


if __name__ == "__main__":
    key = jax.random.PRNGKey(0)
    kx, kp = jax.random.split(key)

    batch, seq, dim = 2, 8, 32
    x = jax.random.normal(kx, (batch, seq, dim), jnp.float32)
    params = init_params(kp, dim)
    prepared = prepare_params(params)   # one-time transpose/pad/bf16 cast

    out = residual_mlp_block(x, prepared)
    out = jax.block_until_ready(out)

    ref = _reference(x, params)
    assert out.shape == x.shape
    max_err = float(jnp.max(jnp.abs(out - ref)))
    # bf16 matmul operands (MXU-native) -> looser tolerance than pure f32.
    # NOTE: bf16 error grows roughly with sqrt(dim); recalibrate for dim >= 2K.
    assert max_err < 5e-2, max_err

    print("KERNEL_OK")
</pallas_src>

<mosaic_0001>
module attributes {stable_mosaic.version = 11 : i64} {
  func.func @_residual_mlp_kernel(%arg0: i32, %arg1: memref<128x128xf32, #tpu.memory_space<vmem>>, %arg2: memref<8x128xf32, #tpu.memory_space<vmem>>, %arg3: memref<128x128xbf16, #tpu.memory_space<vmem>>, %arg4: memref<128x128xbf16, #tpu.memory_space<vmem>>, %arg5: memref<128x128xf32, #tpu.memory_space<vmem>>) attributes {dimension_semantics = [#tpu.dimension_semantics<parallel>], iteration_bounds = array<i64: 1>, scalar_prefetch = 0 : i64, scratch_operands = 0 : i64, tpu.core_type = #tpu.core_type<tc>, window_params = [{transform_indices = @transform_0, window_bounds = array<i64: 128, 128>}, {pipeline_mode = #tpu.pipeline_mode<synchronous>, transform_indices = @transform_1, window_bounds = array<i64: 8, 128>}, {pipeline_mode = #tpu.pipeline_mode<synchronous>, transform_indices = @transform_2, window_bounds = array<i64: 128, 128>}, {pipeline_mode = #tpu.pipeline_mode<synchronous>, transform_indices = @transform_3, window_bounds = array<i64: 128, 128>}, {transform_indices = @transform_4, window_bounds = array<i64: 128, 128>}]} {
    %0 = tpu.iota {dimensions = array<i32: 1>} : vector<1x128xi32>
    %c32_i32 = arith.constant 32 : i32
    %1 = vector.broadcast %c32_i32 : i32 to vector<1x128xi32>
    %2 = arith.cmpi slt, %0, %1 : vector<1x128xi32>
    %c0 = arith.constant 0 : index
    %c0_0 = arith.constant 0 : index
    %3 = vector.load %arg2[%c0, %c0_0] : memref<8x128xf32, #tpu.memory_space<vmem>>, vector<1x128xf32>
    %c1 = arith.constant 1 : index
    %c0_1 = arith.constant 0 : index
    %4 = vector.load %arg2[%c1, %c0_1] : memref<8x128xf32, #tpu.memory_space<vmem>>, vector<1x128xf32>
    %c2 = arith.constant 2 : index
    %c0_2 = arith.constant 0 : index
    %5 = vector.load %arg2[%c2, %c0_2] : memref<8x128xf32, #tpu.memory_space<vmem>>, vector<1x128xf32>
    %c3 = arith.constant 3 : index
    %c0_3 = arith.constant 0 : index
    %6 = vector.load %arg2[%c3, %c0_3] : memref<8x128xf32, #tpu.memory_space<vmem>>, vector<1x128xf32>
    %c4 = arith.constant 4 : index
    %c0_4 = arith.constant 0 : index
    %7 = vector.load %arg2[%c4, %c0_4] : memref<8x128xf32, #tpu.memory_space<vmem>>, vector<1x128xf32>
    %c5 = arith.constant 5 : index
    %c0_5 = arith.constant 0 : index
    %8 = vector.load %arg2[%c5, %c0_5] : memref<8x128xf32, #tpu.memory_space<vmem>>, vector<1x128xf32>
    %c0_6 = arith.constant 0 : index
    %c0_7 = arith.constant 0 : index
    %9 = vector.load %arg1[%c0_6, %c0_7] : memref<128x128xf32, #tpu.memory_space<vmem>>, vector<128x128xf32>
    %cst = arith.constant dense<0.000000e+00> : vector<128xf32>
    %10 = vector.multi_reduction <add>, %9, %cst [1] : vector<128x128xf32> to vector<128xf32>
    %11 = vector.shape_cast %10 : vector<128xf32> to vector<128x1xf32>
    %cst_8 = arith.constant 3.125000e-02 : f32
    %12 = vector.broadcast %cst_8 : f32 to vector<128x1xf32>
    %13 = arith.mulf %11, %12 : vector<128x1xf32>
    %14 = vector.broadcast %13 : vector<128x1xf32> to vector<128x128xf32>
    %15 = arith.subf %9, %14 : vector<128x128xf32>
    %cst_9 = arith.constant 0.000000e+00 : f32
    %16 = vector.shape_cast %2 : vector<1x128xi1> to vector<1x128xi1>
    %17 = vector.broadcast %16 : vector<1x128xi1> to vector<128x128xi1>
    %18 = vector.broadcast %cst_9 : f32 to vector<128x128xf32>
    %19 = arith.select %17, %15, %18 : vector<128x128xi1>, vector<128x128xf32>
    %20 = arith.mulf %19, %19 : vector<128x128xf32>
    %cst_10 = arith.constant dense<0.000000e+00> : vector<128xf32>
    %21 = vector.multi_reduction <add>, %20, %cst_10 [1] : vector<128x128xf32> to vector<128xf32>
    %22 = vector.shape_cast %21 : vector<128xf32> to vector<128x1xf32>
    %cst_11 = arith.constant 3.125000e-02 : f32
    %23 = vector.broadcast %cst_11 : f32 to vector<128x1xf32>
    %24 = arith.mulf %22, %23 : vector<128x1xf32>
    %cst_12 = arith.constant 9.99999974E-6 : f32
    %25 = vector.broadcast %cst_12 : f32 to vector<128x1xf32>
    %26 = arith.addf %24, %25 : vector<128x1xf32>
    %27 = math.rsqrt %26 : vector<128x1xf32>
    %28 = vector.broadcast %27 : vector<128x1xf32> to vector<128x128xf32>
    %29 = arith.mulf %19, %28 : vector<128x128xf32>
    %30 = vector.broadcast %3 : vector<1x128xf32> to vector<128x128xf32>
    %31 = arith.mulf %29, %30 : vector<128x128xf32>
    %32 = vector.broadcast %4 : vector<1x128xf32> to vector<128x128xf32>
    %33 = arith.addf %31, %32 : vector<128x128xf32>
    %34 = arith.truncf %33 : vector<128x128xf32> to vector<128x128xbf16>
    %c0_13 = arith.constant 0 : index
    %c0_14 = arith.constant 0 : index
    %35 = vector.load %arg3[%c0_13, %c0_14] : memref<128x128xbf16, #tpu.memory_space<vmem>>, vector<128x128xbf16>
    %cst_15 = arith.constant dense<0.000000e+00> : vector<128x128xf32>
    %36 = tpu.matmul %34, %35, %cst_15 {dimension_numbers = #tpu.dot_dimension_numbers<[1], [0], [0], [1], [0, 0, 1, 1], [], []>} : vector<128x128xbf16>, vector<128x128xbf16>, vector<128x128xf32> -> vector<128x128xf32>
    %37 = vector.broadcast %5 : vector<1x128xf32> to vector<128x128xf32>
    %38 = arith.addf %36, %37 : vector<128x128xf32>
    %39 = arith.negf %38 : vector<128x128xf32>
    %40 = math.exp %39 : vector<128x128xf32>
    %cst_16 = arith.constant 1.000000e+00 : f32
    %41 = vector.broadcast %cst_16 : f32 to vector<128x128xf32>
    %42 = arith.addf %41, %40 : vector<128x128xf32>
    %43 = arith.divf %41, %42 : vector<128x128xf32>
    %44 = arith.mulf %38, %43 : vector<128x128xf32>
    %cst_17 = arith.constant dense<0.000000e+00> : vector<128xf32>
    %45 = vector.multi_reduction <add>, %44, %cst_17 [1] : vector<128x128xf32> to vector<128xf32>
    %46 = vector.shape_cast %45 : vector<128xf32> to vector<128x1xf32>
    %cst_18 = arith.constant 3.125000e-02 : f32
    %47 = vector.broadcast %cst_18 : f32 to vector<128x1xf32>
    %48 = arith.mulf %46, %47 : vector<128x1xf32>
    %49 = vector.broadcast %48 : vector<128x1xf32> to vector<128x128xf32>
    %50 = arith.subf %44, %49 : vector<128x128xf32>
    %cst_19 = arith.constant 0.000000e+00 : f32
    %51 = vector.shape_cast %2 : vector<1x128xi1> to vector<1x128xi1>
    %52 = vector.broadcast %51 : vector<1x128xi1> to vector<128x128xi1>
    %53 = vector.broadcast %cst_19 : f32 to vector<128x128xf32>
    %54 = arith.select %52, %50, %53 : vector<128x128xi1>, vector<128x128xf32>
    %55 = arith.mulf %54, %54 : vector<128x128xf32>
    %cst_20 = arith.constant dense<0.000000e+00> : vector<128xf32>
    %56 = vector.multi_reduction <add>, %55, %cst_20 [1] : vector<128x128xf32> to vector<128xf32>
    %57 = vector.shape_cast %56 : vector<128xf32> to vector<128x1xf32>
    %cst_21 = arith.constant 3.125000e-02 : f32
    %58 = vector.broadcast %cst_21 : f32 to vector<128x1xf32>
    %59 = arith.mulf %57, %58 : vector<128x1xf32>
    %cst_22 = arith.constant 9.99999974E-6 : f32
    %60 = vector.broadcast %cst_22 : f32 to vector<128x1xf32>
    %61 = arith.addf %59, %60 : vector<128x1xf32>
    %62 = math.rsqrt %61 : vector<128x1xf32>
    %63 = vector.broadcast %62 : vector<128x1xf32> to vector<128x128xf32>
    %64 = arith.mulf %54, %63 : vector<128x128xf32>
    %65 = vector.broadcast %6 : vector<1x128xf32> to vector<128x128xf32>
    %66 = arith.mulf %64, %65 : vector<128x128xf32>
    %67 = vector.broadcast %7 : vector<1x128xf32> to vector<128x128xf32>
    %68 = arith.addf %66, %67 : vector<128x128xf32>
    %69 = arith.truncf %68 : vector<128x128xf32> to vector<128x128xbf16>
    %c0_23 = arith.constant 0 : index
    %c0_24 = arith.constant 0 : index
    %70 = vector.load %arg4[%c0_23, %c0_24] : memref<128x128xbf16, #tpu.memory_space<vmem>>, vector<128x128xbf16>
    %cst_25 = arith.constant dense<0.000000e+00> : vector<128x128xf32>
    %71 = tpu.matmul %69, %70, %cst_25 {dimension_numbers = #tpu.dot_dimension_numbers<[1], [0], [0], [1], [0, 0, 1, 1], [], []>} : vector<128x128xbf16>, vector<128x128xbf16>, vector<128x128xf32> -> vector<128x128xf32>
    %72 = vector.broadcast %8 : vector<1x128xf32> to vector<128x128xf32>
    %73 = arith.addf %71, %72 : vector<128x128xf32>
    %c0_26 = arith.constant 0 : index
    %c0_27 = arith.constant 0 : index
    %74 = vector.load %arg1[%c0_26, %c0_27] : memref<128x128xf32, #tpu.memory_space<vmem>>, vector<128x128xf32>
    %75 = arith.addf %73, %74 : vector<128x128xf32>
    %c0_28 = arith.constant 0 : index
    %c0_29 = arith.constant 0 : index
    %76 = vector.load %arg5[%c0_28, %c0_29] : memref<128x128xf32, #tpu.memory_space<vmem>>, vector<128x128xf32>
    tpu.vector_store %arg5[%c0_28, %c0_29], %75 {strides = array<i32>} : memref<128x128xf32, #tpu.memory_space<vmem>>, vector<128x128xf32>,
    return
  }
  func.func @transform_0(%arg0: i32) -> (i32, i32) {
    %c0_i32 = arith.constant 0 : i32
    %c0_i32_0 = arith.constant 0 : i32
    return %arg0, %c0_i32 : i32, i32
  }
  func.func @transform_1(%arg0: i32) -> (i32, i32) {
    %c0_i32 = arith.constant 0 : i32
    %c0_i32_0 = arith.constant 0 : i32
    %c0_i32_1 = arith.constant 0 : i32
    return %c0_i32, %c0_i32_0 : i32, i32
  }
  func.func @transform_2(%arg0: i32) -> (i32, i32) {
    %c0_i32 = arith.constant 0 : i32
    %c0_i32_0 = arith.constant 0 : i32
    %c0_i32_1 = arith.constant 0 : i32
    return %c0_i32, %c0_i32_0 : i32, i32
  }
  func.func @transform_3(%arg0: i32) -> (i32, i32) {
    %c0_i32 = arith.constant 0 : i32
    %c0_i32_0 = arith.constant 0 : i32
    %c0_i32_1 = arith.constant 0 : i32
    return %c0_i32, %c0_i32_0 : i32, i32
  }
  func.func @transform_4(%arg0: i32) -> (i32, i32) {
    %c0_i32 = arith.constant 0 : i32
    %c0_i32_0 = arith.constant 0 : i32
    return %arg0, %c0_i32 : i32, i32
  }
}

</mosaic_0001>

<bundles_post_ra>
// kernel: _residual_mlp_impl.1
= control target key start
LH: loop header
LB: loop body
LE: loop exit
PB: predicated region body
PF: predicated region fallthrough
CT: control target
= control target key end

     0   :  { %9 = vsyncpa [#allocation3], 0  ;;  %s2004_s0 = inlined_call_operand.vmem [shape: f32[16,128], index: 0, kind: input, shape index: {}]   ;;  %s2005_s1 = inlined_call_operand.vmem [shape: f32[8,128], index: 1, kind: input, shape index: {}]   ;;  %s2006_s2 = inlined_call_operand.hbm [shape: bf16[128,128], index: 2, kind: input, shape index: {}]   ;;  %s2007_s3 = inlined_call_operand.hbm [shape: bf16[128,128], index: 3, kind: input, shape index: {}]   ;;  %s2008_s4 = inlined_call_operand.vmem [shape: f32[16,128], index: 4, kind: output, shape index: {}]  }
   0x1   :  { %10 = vsyncpa [#allocation5], 0  ;;  %s1402_s15 = smov [#allocation2]  }
   0x2   :  { %s20_s16 = sshll.u32 %s1402_s15, 4  ;;  %s21_s16 = int_to_ptr.vmem [resolvable:$true] %s20_s16 }
   0x3   :  { %s1366_s17 = scalar_lea.vmem %s21_s16, 1024  ;;  %p1371_p1 = scmp.lt.s32.totalorder %s21_s16, %s21_s16 }
   0x4   :  { %p1367_p0 = scmp.ne.s32.totalorder %s21_s16, %s1366_s17  ;;  %p1372_p2 = scmp.lt.s32.totalorder %s1366_s17, %s1366_s17 }
   0x6   :  { %p1373_p3 = por %p1372_p2, %p1371_p1 }
   0x8   :  { %p1374_p4 = pnand %p1373_p3, %p1367_p0 }
   0xa   :  { %1377 = shalt.err (!%p1374_p4)
}
   0xb   :  { %s1403_s18 = smov 64   ;;  %s1404_s19 = smov 4  }
   0xc   :  { %26 = dma.hbm_to_vmem [thread:$0]  %s2006_s2, 1024, %s21_s16, [#allocation3], %s1403_s18, %s1403_s18, %s1404_s19  }
   0xd   :  { %s1405_s22 = smov [#allocation4]  }
   0xe   :  { %s32_s23 = sshll.u32 %s1405_s22, 4  ;;  %s33_s23 = int_to_ptr.vmem [resolvable:$true] %s32_s23 }
   0xf   :  { %s1386_s24 = scalar_lea.vmem %s33_s23, 1024  ;;  %p1391_p6 = scmp.lt.s32.totalorder %s33_s23, %s33_s23 }
  0x10   :  { %p1387_p5 = scmp.ne.s32.totalorder %s33_s23, %s1386_s24  ;;  %p1392_p7 = scmp.lt.s32.totalorder %s1386_s24, %s1386_s24 }
  0x12   :  { %p1393_p8 = por %p1392_p7, %p1391_p6 }
  0x14   :  { %p1394_p9 = pnand %p1393_p8, %p1387_p5 }
  0x16   :  { %1397 = shalt.err (!%p1394_p9)
}
  0x17   :  { %38 = dma.hbm_to_vmem [thread:$0]  %s2007_s3, 1024, %s33_s23, [#allocation5], %s1403_s18, %s1403_s18, %s1404_s19  }
  0x18   :  { %1398 = dma.done.wait [#allocation3], 1024  }
  0x19   :  { %1399 = vsyncadd [#allocation3], 4294966272 }
  0x1a   :  { %1400 = dma.done.wait [#allocation5], 1024  }
  0x1b   :  { %1401 = vsyncadd [#allocation5], 4294966272  ;;  %v55_v0 = vld [vmem:[%s2004_s0] sm:$0xff]  ;;  %v57_v1 = vld [vmem:[%s2004_s0 + $0x10] sm:$0xff]  ;;  %v46_v16 = vlaneseq }
  0x1c   :  { %71 = vadd.xlane.f32.xlu0 %v55_v0  ;;  %75 = vadd.xlane.f32.xlu1 %v57_v1  ;;  %v56_v2 = vld [vmem:[%s2004_s0 + $0x8] sm:$0xff]  ;;  %v58_v3 = vld [vmem:[%s2004_s0 + $0x18] sm:$0xff]  ;;  %v1452_v4 = vld [vmem:[%s2004_s0 + $0x20] sm:$0xff] }
  0x1d   :  { %v60_v5 = vld [vmem:[%s2004_s0 + $0x28] sm:$0xff]  ;;  %v1460_v6 = vld [vmem:[%s2004_s0 + $0x30] sm:$0xff]  ;;  %v1465_v7 = vld [vmem:[%s2004_s0 + $0x38] sm:$0xff]  ;;  %v1518_v17 = vand.u32 127, %v46_v16 }
  0x1e   :  { %v1471_v8 = vld [vmem:[%s2004_s0 + $0x40] sm:$0xff]  ;;  %v1478_v9 = vld [vmem:[%s2004_s0 + $0x48] sm:$0xff]  ;;  %v1485_v10 = vld [vmem:[%s2004_s0 + $0x50] sm:$0xff] }
  0x1f   :  { %v1490_v11 = vld [vmem:[%s2004_s0 + $0x58] sm:$0xff]  ;;  %v1497_v12 = vld [vmem:[%s2004_s0 + $0x60] sm:$0xff]  ;;  %v1502_v13 = vld [vmem:[%s2004_s0 + $0x68] sm:$0xff]  ;;  %vm48_vm0 = vcmp.lt.s32.totalorder %v1518_v17, 32 }
  0x20   :  { %73 = vadd.xlane.f32.xlu0 %v56_v2  ;;  %77 = vadd.xlane.f32.xlu1 %v58_v3  ;;  %v1509_v14 = vld [vmem:[%s2004_s0 + $0x70] sm:$0xff]  ;;  %v1514_v15 = vld [vmem:[%s2004_s0 + $0x78] sm:$0xff] }
  0x21   :  { %v1212_v61 = vld [vmem:[#allocation2 + $0x38] sm:$0xff]   ;;  %v1213_v16 = vld [vmem:[#allocation2 + $0x30] sm:$0xff]  }
  0x22   :  { %1144 = vmatprep.subr.bf16.mxu0 %v1212_v61 }
  0x23   :  { %1145 = vmatpush3.bf16.msra.mxu0 %v1212_v61 }
  0x24   :  { %79 = vadd.xlane.f32.xlu0 %v1452_v4  ;;  %81 = vadd.xlane.f32.xlu1 %v60_v5 }
  0x25   :  { %1146 = vmatprep.subr.bf16.mxu0 %v1213_v16 }
  0x27   :  { %1147 = vmatpush3.bf16.msra.mxu0 %v1213_v16 }
  0x28   :  { %83 = vadd.xlane.f32.xlu0 %v1460_v6  ;;  %85 = vadd.xlane.f32.xlu1 %v1465_v7 }
  0x2c   :  { %87 = vadd.xlane.f32.xlu0 %v1471_v8  ;;  %89 = vadd.xlane.f32.xlu1 %v1478_v9 }
  0x30   :  { %91 = vadd.xlane.f32.xlu0 %v1485_v10  ;;  %93 = vadd.xlane.f32.xlu1 %v1490_v11 }
  0x34   :  { %95 = vadd.xlane.f32.xlu0 %v1497_v12  ;;  %97 = vadd.xlane.f32.xlu1 %v1502_v13 }
  0x38   :  { %99 = vadd.xlane.f32.xlu0 %v1509_v14  ;;  %101 = vadd.xlane.f32.xlu1 %v1514_v15 }
  0xa5   :  { %v72_v18 = vpop.xlane.xlu0 %71  ;;  %v76_v19 = vpop.xlane.xlu1 %75 }
  0xa6   :  { %v103_v20 = vmul.f32 0.03125, %v72_v18  ;;  %v105_v21 = vmul.f32 0.03125, %v76_v19 }
  0xa8   :  { %v119_v22 = vsub.f32 %v55_v0, %v103_v20  ;;  %v121_v23 = vsub.f32 %v57_v1, %v105_v21 }
  0xa9   :  { %v74_v24 = vpop.xlane.xlu0 %73  ;;  %v78_v25 = vpop.xlane.xlu1 %77 }
  0xaa   :  { %v104_v26 = vmul.f32 0.03125, %v74_v24  ;;  %v106_v27 = vmul.f32 0.03125, %v78_v25  ;;  %v1523_v28 = vsel %vm48_vm0, %v119_v22, 0.0  ;;  %v1527_v29 = vsel %vm48_vm0, %v121_v23, 0.0 }
  0xab   :  { %v153_v30 = vmul.f32 %v1523_v28, %v1523_v28  ;;  %v155_v35 = vmul.f32 %v1527_v29, %v1527_v29 }
  0xac   :  { %v120_v31 = vsub.f32 %v56_v2, %v104_v26  ;;  %v122_v32 = vsub.f32 %v58_v3, %v106_v27  ;;  %v1214_v26 = vld [vmem:[#allocation2 + $0x28] sm:$0xff]  }
  0xad   :  { %169 = vadd.xlane.f32.xlu0 %v153_v30  ;;  %v80_v33 = vpop.xlane.xlu0 %79  ;;  %v82_v34 = vpop.xlane.xlu1 %81  ;;  %1148 = vmatprep.subr.bf16.mxu0 %v1214_v26 }
  0xae   :  { %v107_v36 = vmul.f32 0.03125, %v80_v33  ;;  %v108_v37 = vmul.f32 0.03125, %v82_v34  ;;  %v1535_v38 = vsel %vm48_vm0, %v120_v31, 0.0  ;;  %v1539_v39 = vsel %vm48_vm0, %v122_v32, 0.0  ;;  %1149 = vmatpush3.bf16.msra.mxu0 %v1214_v26 }
  0xaf   :  { %v154_v40 = vmul.f32 %v1535_v38, %v1535_v38  ;;  %v156_v45 = vmul.f32 %v1539_v39, %v1539_v39 }
  0xb0   :  { %v123_v41 = vsub.f32 %v1452_v4, %v107_v36  ;;  %v124_v42 = vsub.f32 %v60_v5, %v108_v37  ;;  %v1215_v37 = vld [vmem:[#allocation2 + $0x20] sm:$0xff]  }
  0xb1   :  { %173 = vadd.xlane.f32.xlu0 %v155_v35  ;;  %171 = vadd.xlane.f32.xlu1 %v154_v40  ;;  %v84_v43 = vpop.xlane.xlu0 %83  ;;  %v86_v44 = vpop.xlane.xlu1 %85 }
  0xb2   :  { %v109_v46 = vmul.f32 0.03125, %v84_v43  ;;  %v110_v47 = vmul.f32 0.03125, %v86_v44  ;;  %v1548_v48 = vsel %vm48_vm0, %v123_v41, 0.0  ;;  %v1552_v49 = vsel %vm48_vm0, %v124_v42, 0.0  ;;  %1150 = vmatprep.subr.bf16.mxu0 %v1215_v37  ;;  %v1217_v44 = vld [vmem:[#allocation2 + $0x10] sm:$0xff]  }
  0xb3   :  { %v157_v50 = vmul.f32 %v1548_v48, %v1548_v48  ;;  %v158_v55 = vmul.f32 %v1552_v49, %v1552_v49  ;;  %1151 = vmatpush3.bf16.msra.mxu0 %v1215_v37  ;;  %v1638_v37 = vld [vmem:[%s2005_s1 + $0x1] ss:$0 sm:$0xff] }
  0xb4   :  { %v125_v51 = vsub.f32 %v1460_v6, %v109_v46  ;;  %v126_v52 = vsub.f32 %v1465_v7, %v110_v47  ;;  %v1219_v46 = vld [vmem:[#allocation2] sm:$0xff]  }
  0xb5   :  { %175 = vadd.xlane.f32.xlu1 %v156_v45  ;;  %177 = vadd.xlane.f32.xlu0 %v157_v50  ;;  %v88_v53 = vpop.xlane.xlu0 %87  ;;  %v90_v54 = vpop.xlane.xlu1 %89  ;;  %v1218_v45 = vld [vmem:[#allocation2 + $0x8] sm:$0xff]  }
  0xb6   :  { %v111_v56 = vmul.f32 0.03125, %v88_v53  ;;  %v112_v57 = vmul.f32 0.03125, %v90_v54  ;;  %v1562_v58 = vsel %vm48_vm0, %v125_v51, 0.0  ;;  %v1566_v59 = vsel %vm48_vm0, %v126_v52, 0.0 }
  0xb7   :  { %v159_v60 = vmul.f32 %v1562_v58, %v1562_v58  ;;  %v160_v2 = vmul.f32 %v1566_v59, %v1566_v59 }
  0xb8   :  { %v127_v62 = vsub.f32 %v1471_v8, %v111_v56  ;;  %v128_v63 = vsub.f32 %v1478_v9, %v112_v57 }
  0xb9   :  { %179 = vadd.xlane.f32.xlu1 %v158_v55  ;;  %181 = vadd.xlane.f32.xlu0 %v159_v60  ;;  %v92_v0 = vpop.xlane.xlu0 %91  ;;  %v94_v1 = vpop.xlane.xlu1 %93 }
  0xba   :  { %v113_v3 = vmul.f32 0.03125, %v92_v0  ;;  %v114_v4 = vmul.f32 0.03125, %v94_v1  ;;  %v1576_v5 = vsel %vm48_vm0, %v127_v62, 0.0  ;;  %v1580_v6 = vsel %vm48_vm0, %v128_v63, 0.0 }
  0xbb   :  { %v161_v7 = vmul.f32 %v1576_v5, %v1576_v5  ;;  %v162_v20 = vmul.f32 %v1580_v6, %v1580_v6 }
  0xbc   :  { %v129_v8 = vsub.f32 %v1485_v10, %v113_v3  ;;  %v130_v9 = vsub.f32 %v1490_v11, %v114_v4 }
  0xbd   :  { %183 = vadd.xlane.f32.xlu1 %v160_v2  ;;  %185 = vadd.xlane.f32.xlu0 %v161_v7  ;;  %v96_v18 = vpop.xlane.xlu0 %95  ;;  %v98_v19 = vpop.xlane.xlu1 %97 }
  0xbe   :  { %v115_v21 = vmul.f32 0.03125, %v96_v18  ;;  %v116_v22 = vmul.f32 0.03125, %v98_v19  ;;  %v1590_v23 = vsel %vm48_vm0, %v129_v8, 0.0  ;;  %v1594_v24 = vsel %vm48_vm0, %v130_v9, 0.0 }
  0xbf   :  { %v163_v10 = vmul.f32 %v1590_v23, %v1590_v23  ;;  %v164_v31 = vmul.f32 %v1594_v24, %v1594_v24 }
  0xc0   :  { %v131_v11 = vsub.f32 %v1497_v12, %v115_v21  ;;  %v132_v25 = vsub.f32 %v1502_v13, %v116_v22 }
  0xc1   :  { %187 = vadd.xlane.f32.xlu1 %v162_v20  ;;  %189 = vadd.xlane.f32.xlu0 %v163_v10  ;;  %v100_v27 = vpop.xlane.xlu0 %99  ;;  %v102_v30 = vpop.xlane.xlu1 %101 }
  0xc2   :  { %v117_v32 = vmul.f32 0.03125, %v100_v27  ;;  %v118_v33 = vmul.f32 0.03125, %v102_v30  ;;  %v1604_v34 = vsel %vm48_vm0, %v131_v11, 0.0  ;;  %v1608_v35 = vsel %vm48_vm0, %v132_v25, 0.0  ;;  %v1631_v11 = vld [vmem:[%s2005_s1] ss:$0 sm:$0xff] }
  0xc3   :  { %v165_v12 = vmul.f32 %v1604_v34, %v1604_v34  ;;  %v166_v40 = vmul.f32 %v1608_v35, %v1608_v35 }
  0xc4   :  { %v133_v13 = vsub.f32 %v1509_v14, %v117_v32  ;;  %v134_v36 = vsub.f32 %v1514_v15, %v118_v33  ;;  %v1216_v15 = vld [vmem:[#allocation2 + $0x18] sm:$0xff]  }
  0xc5   :  { %191 = vadd.xlane.f32.xlu1 %v164_v31  ;;  %193 = vadd.xlane.f32.xlu0 %v165_v12 }
  0xc6   :  { %v1618_v41 = vsel %vm48_vm0, %v133_v13, 0.0  ;;  %v1622_v42 = vsel %vm48_vm0, %v134_v36, 0.0  ;;  %1152 = vmatprep.subr.bf16.mxu0 %v1216_v15 }
  0xc7   :  { %v167_v14 = vmul.f32 %v1618_v41, %v1618_v41  ;;  %v168_v43 = vmul.f32 %v1622_v42, %v1622_v42  ;;  %1153 = vmatpush3.bf16.msra.mxu0 %v1216_v15 }
  0xc8   :  { %1154 = vmatprep.subr.bf16.mxu0 %v1217_v44 }
  0xc9   :  { %195 = vadd.xlane.f32.xlu1 %v166_v40  ;;  %197 = vadd.xlane.f32.xlu0 %v167_v14 }
  0xcb   :  { %1155 = vmatpush3.bf16.msra.mxu0 %v1217_v44 }
  0xcc   :  { %1156 = vmatprep.subr.bf16.mxu0 %v1218_v45 }
  0xcd   :  { %199 = vadd.xlane.f32.xlu1 %v168_v43 }
  0xcf   :  { %1157 = vmatpush3.bf16.msra.mxu0 %v1218_v45 }
  0xd0   :  { %1158 = vmatprep.subr.bf16.mxu0 %v1219_v46 }
  0xd3   :  { %1159 = vmatpush3.bf16.msra.mxu0 %v1219_v46 }
 0x136   :  { %v170_v47 = vpop.xlane.xlu0 %169 }
 0x137   :  { %v201_v50 = vmul.f32 0.03125, %v170_v47 }
 0x139   :  { %v217_v51 = vadd.f32 1e-05, %v201_v50 }
 0x13a   :  { %v172_v52 = vpop.xlane.xlu1 %171  ;;  %v174_v53 = vpop.xlane.xlu0 %173 }
 0x13b   :  { %1228 = vrsqrt.f32 %v217_v51  ;;  %v202_v54 = vmul.f32 0.03125, %v172_v52  ;;  %v203_v55 = vmul.f32 0.03125, %v174_v53 }
 0x13d   :  { %v218_v56 = vadd.f32 1e-05, %v202_v54  ;;  %v219_v57 = vadd.f32 1e-05, %v203_v55 }
 0x13e   :  { %v176_v60 = vpop.xlane.xlu1 %175  ;;  %v178_v61 = vpop.xlane.xlu0 %177 }
 0x13f   :  { %1230 = vrsqrt.f32 %v218_v56  ;;  %v204_v62 = vmul.f32 0.03125, %v176_v60  ;;  %v205_v63 = vmul.f32 0.03125, %v178_v61 }
 0x140   :  { %1232 = vrsqrt.f32 %v219_v57 }
 0x141   :  { %v220_v0 = vadd.f32 1e-05, %v204_v62  ;;  %v221_v1 = vadd.f32 1e-05, %v205_v63 }
 0x142   :  { %v180_v2 = vpop.xlane.xlu1 %179  ;;  %v182_v3 = vpop.xlane.xlu0 %181 }
 0x143   :  { %1234 = vrsqrt.f32 %v220_v0  ;;  %v206_v4 = vmul.f32 0.03125, %v180_v2  ;;  %v207_v7 = vmul.f32 0.03125, %v182_v3 }
 0x144   :  { %1236 = vrsqrt.f32 %v221_v1 }
 0x145   :  { %v222_v8 = vadd.f32 1e-05, %v206_v4  ;;  %v223_v9 = vadd.f32 1e-05, %v207_v7 }
 0x146   :  { %v184_v16 = vpop.xlane.xlu1 %183  ;;  %v186_v18 = vpop.xlane.xlu0 %185 }
 0x147   :  { %1238 = vrsqrt.f32 %v222_v8  ;;  %v208_v19 = vmul.f32 0.03125, %v184_v16  ;;  %v209_v20 = vmul.f32 0.03125, %v186_v18 }
 0x148   :  { %v1229_v21 = vpop.eup %1228  ;;  %1240 = vrsqrt.f32 %v223_v9 }
 0x149   :  { %v224_v22 = vadd.f32 1e-05, %v208_v19  ;;  %v225_v10 = vadd.f32 1e-05, %v209_v20  ;;  %v249_v25 = vmul.f32 %v1229_v21, %v1523_v28 }
 0x14a   :  { %v188_v26 = vpop.xlane.xlu1 %187  ;;  %v190_v27 = vpop.xlane.xlu0 %189 }
 0x14b   :  { %1242 = vrsqrt.f32 %v224_v22  ;;  %v210_v30 = vmul.f32 0.03125, %v188_v26  ;;  %v211_v31 = vmul.f32 0.03125, %v190_v27  ;;  %v269_v33 = vmul.f32 %v1631_v11, %v249_v25 }
 0x14c   :  { %v1231_v32 = vpop.eup %1230  ;;  %1244 = vrsqrt.f32 %v225_v10 }
 0x14d   :  { %v1233_v12 = vpop.eup %1232  ;;  %v226_v13 = vadd.f32 1e-05, %v210_v30  ;;  %v227_v36 = vadd.f32 1e-05, %v211_v31  ;;  %v250_v40 = vmul.f32 %v1231_v32, %v1535_v38  ;;  %v289_v47 = vadd.f32 %v1638_v37, %v269_v33 }
 0x14e   :  { %v192_v28 = vpop.xlane.xlu1 %191  ;;  %v194_v14 = vpop.xlane.xlu0 %193  ;;  %v251_v15 = vmul.f32 %v1233_v12, %v1527_v29 }
 0x14f   :  { %1246 = vrsqrt.f32 %v226_v13  ;;  %v212_v43 = vmul.f32 0.03125, %v192_v28  ;;  %v213_v44 = vmul.f32 0.03125, %v194_v14  ;;  %v270_v45 = vmul.f32 %v1631_v11, %v250_v40 }
 0x150   :  { %v1235_v46 = vpop.eup %1234  ;;  %1248 = vrsqrt.f32 %v227_v36  ;;  %v271_v29 = vmul.f32 %v1631_v11, %v251_v15 }
 0x151   :  { %v1237_v50 = vpop.eup %1236  ;;  %v228_v51 = vadd.f32 1e-05, %v212_v43  ;;  %v229_v52 = vadd.f32 1e-05, %v213_v44  ;;  %v290_v53 = vadd.f32 %v1638_v37, %v270_v45  ;;  %v252_v38 = vmul.f32 %v1235_v46, %v1539_v39 }
 0x152   :  { %v196_v54 = vpop.xlane.xlu1 %195  ;;  %v198_v55 = vpop.xlane.xlu0 %197  ;;  %v253_v56 = vmul.f32 %v1237_v50, %v1548_v48  ;;  %v291_v7 = vadd.f32 %v1638_v37, %v271_v29 }
 0x153   :  { %1250 = vrsqrt.f32 %v228_v51  ;;  %v214_v57 = vmul.f32 0.03125, %v196_v54  ;;  %v215_v60 = vmul.f32 0.03125, %v198_v55  ;;  %v305_v61 = vpack.c.bf16 %v290_v53, %v289_v47 }
 0x154   :  { %v1239_v62 = vpop.eup %1238  ;;  %1252 = vrsqrt.f32 %v229_v52  ;;  %v272_v63 = vmul.f32 %v1631_v11, %v252_v38  ;;  %v273_v0 = vmul.f32 %v1631_v11, %v253_v56 }
 0x155   :  { %v1241_v1 = vpop.eup %1240  ;;  %v230_v2 = vadd.f32 1e-05, %v214_v57  ;;  %v231_v3 = vadd.f32 1e-05, %v215_v60  ;;  %1160 = vmatprep.mubr.bf16.mxu0 %v305_v61  ;;  %v254_v39 = vmul.f32 %v1239_v62, %v1552_v49 }
 0x156   :  { %v200_v4 = vpop.xlane.xlu1 %199  ;;  %v292_v48 = vadd.f32 %v1638_v37, %v272_v63  ;;  %v255_v8 = vmul.f32 %v1241_v1, %v1562_v58  ;;  %v293_v20 = vadd.f32 %v1638_v37, %v273_v0  ;;  %v1689_v63 = vld [vmem:[%s2005_s1 + $0x2] ss:$0 sm:$0xff] }
 0x157   :  { %1254 = vrsqrt.f32 %v230_v2  ;;  %v216_v9 = vmul.f32 0.03125, %v200_v4  ;;  %v274_v16 = vmul.f32 %v1631_v11, %v254_v39 }
 0x158   :  { %v1243_v18 = vpop.eup %1242  ;;  %1256 = vrsqrt.f32 %v231_v3  ;;  %v306_v19 = vpack.c.bf16 %v292_v48, %v291_v7  ;;  %v275_v25 = vmul.f32 %v1631_v11, %v255_v8 }
 0x159   :  { %v1245_v21 = vpop.eup %1244  ;;  %v232_v22 = vadd.f32 1e-05, %v216_v9  ;;  %v294_v49 = vadd.f32 %v1638_v37, %v274_v16  ;;  %v256_v10 = vmul.f32 %v1243_v18, %v1566_v59 }
 0x15a   :  { %1161 = vmatmul.mubr.bf16.vlgmr.msra.gmra.mxu0 %v306_v19  ;;  %v257_v58 = vmul.f32 %v1245_v21, %v1576_v5  ;;  %v295_v32 = vadd.f32 %v1638_v37, %v275_v25 }
 0x15b   :  { %1258 = vrsqrt.f32 %v232_v22  ;;  %v307_v26 = vpack.c.bf16 %v294_v49, %v293_v20  ;;  %v276_v27 = vmul.f32 %v1631_v11, %v256_v10 }
 0x15c   :  { %v1247_v30 = vpop.eup %1246  ;;  %v277_v59 = vmul.f32 %v1631_v11, %v257_v58 }
 0x15d   :  { %v1249_v31 = vpop.eup %1248  ;;  %1164 = vmatprep.mubr.bf16.mxu0 %v307_v26  ;;  %v296_v33 = vadd.f32 %v1638_v37, %v276_v27  ;;  %v258_v12 = vmul.f32 %v1247_v30, %v1580_v6 }
 0x15e   :  { %v259_v13 = vmul.f32 %v1249_v31, %v1590_v23  ;;  %v297_v14 = vadd.f32 %v1638_v37, %v277_v59 }
 0x15f   :  { %v308_v36 = vpack.c.bf16 %v296_v33, %v295_v32  ;;  %v278_v5 = vmul.f32 %v1631_v11, %v258_v12 }
 0x160   :  { %v1251_v40 = vpop.eup %1250  ;;  %v279_v44 = vmul.f32 %v1631_v11, %v259_v13 }
 0x161   :  { %v1253_v28 = vpop.eup %1252  ;;  %v298_v15 = vadd.f32 %v1638_v37, %v278_v5  ;;  %v260_v43 = vmul.f32 %v1251_v40, %v1594_v24 }
 0x162   :  { %1165 = vmatmul.mubr.bf16.gmra.mxu0 %v308_v36  ;;  %v261_v6 = vmul.f32 %v1253_v28, %v1604_v34  ;;  %v299_v50 = vadd.f32 %v1638_v37, %v279_v44 }
 0x163   :  { %v309_v45 = vpack.c.bf16 %v298_v15, %v297_v14  ;;  %v280_v46 = vmul.f32 %v1631_v11, %v260_v43 }
 0x164   :  { %v1255_v23 = vpop.eup %1254  ;;  %v281_v53 = vmul.f32 %v1631_v11, %v261_v6 }
 0x165   :  { %v1257_v47 = vpop.eup %1256  ;;  %1168 = vmatprep.mubr.bf16.mxu0 %v309_v45  ;;  %v300_v51 = vadd.f32 %v1638_v37, %v280_v46  ;;  %v262_v52 = vmul.f32 %v1255_v23, %v1608_v35 }
 0x166   :  { %v263_v24 = vmul.f32 %v1257_v47, %v1618_v41  ;;  %v301_v55 = vadd.f32 %v1638_v37, %v281_v53 }
 0x167   :  { %v310_v38 = vpack.c.bf16 %v300_v51, %v299_v50  ;;  %v282_v54 = vmul.f32 %v1631_v11, %v262_v52 }
 0x168   :  { %v1259_v34 = vpop.eup %1258  ;;  %v283_v57 = vmul.f32 %v1631_v11, %v263_v24 }
 0x169   :  { %v302_v29 = vadd.f32 %v1638_v37, %v282_v54  ;;  %v264_v56 = vmul.f32 %v1259_v34, %v1622_v42 }
 0x16a   :  { %1169 = vmatmul.mubr.bf16.gmra.mxu0 %v310_v38  ;;  %v303_v61 = vadd.f32 %v1638_v37, %v283_v57 }
 0x16b   :  { %v311_v60 = vpack.c.bf16 %v302_v29, %v301_v55  ;;  %v284_v35 = vmul.f32 %v1631_v11, %v264_v56 }
 0x16d   :  { %1172 = vmatprep.mubr.bf16.mxu0 %v311_v60  ;;  %v304_v41 = vadd.f32 %v1638_v37, %v284_v35 }
 0x16f   :  { %v312_v62 = vpack.c.bf16 %v304_v41, %v303_v61 }
 0x172   :  { %1173 = vmatmul.mubr.bf16.gmra.mxu0 %v312_v62 }
 0x21a   :  { %v1162_v0 = vpop.f32.mrf.mxu0 }
 0x21b   :  { %v1692_v42 = vadd.f32 %v1162_v0, %v1689_v63 }
 0x21c   :  { %v415_v1 = vpop.f32.mrf.mxu0 }
 0x21d   :  { %v1087_v2 = vmul.f32 -1.442695, %v1692_v42  ;;  %v1696_v11 = vadd.f32 %v1689_v63, %v415_v1 }
 0x21e   :  { %v1163_v3 = vpop.f32.mrf.mxu0 }
 0x21f   :  { %1260 = vpow2.f32 %v1087_v2  ;;  %v1085_v37 = vmul.f32 -1.442695, %v1696_v11  ;;  %v1700_v39 = vadd.f32 %v1163_v3, %v1689_v63 }
 0x220   :  { %v418_v4 = vpop.f32.mrf.mxu0 }
 0x221   :  { %1262 = vpow2.f32 %v1085_v37  ;;  %v1088_v7 = vmul.f32 -1.442695, %v1700_v39  ;;  %v1704_v48 = vadd.f32 %v1689_v63, %v418_v4 }
 0x222   :  { %v1166_v8 = vpop.f32.mrf.mxu0 }
 0x223   :  { %1264 = vpow2.f32 %v1088_v7  ;;  %v1086_v9 = vmul.f32 -1.442695, %v1704_v48  ;;  %v1708_v16 = vadd.f32 %v1166_v8, %v1689_v63 }
 0x224   :  { %v431_v18 = vpop.f32.mrf.mxu0 }
 0x225   :  { %1266 = vpow2.f32 %v1086_v9  ;;  %v1091_v19 = vmul.f32 -1.442695, %v1708_v16  ;;  %v1712_v20 = vadd.f32 %v1689_v63, %v431_v18 }
 0x226   :  { %v1167_v21 = vpop.f32.mrf.mxu0 }
 0x227   :  { %1268 = vpow2.f32 %v1091_v19  ;;  %v1089_v22 = vmul.f32 -1.442695, %v1712_v20  ;;  %v1716_v49 = vadd.f32 %v1167_v21, %v1689_v63 }
 0x228   :  { %v434_v10 = vpop.f32.mrf.mxu0 }
 0x229   :  { %1270 = vpow2.f32 %v1089_v22  ;;  %v1092_v25 = vmul.f32 -1.442695, %v1716_v49  ;;  %v1720_v58 = vadd.f32 %v1689_v63, %v434_v10 }
 0x22a   :  { %v1170_v26 = vpop.f32.mrf.mxu0 }
 0x22b   :  { %1272 = vpow2.f32 %v1092_v25  ;;  %v1090_v27 = vmul.f32 -1.442695, %v1720_v58  ;;  %v1724_v30 = vadd.f32 %v1170_v26, %v1689_v63 }
 0x22c   :  { %v1261_v31 = vpop.eup %1260  ;;  %v447_v32 = vpop.f32.mrf.mxu0 }
 0x22d   :  { %v528_v33 = vadd.f32 1.0, %v1261_v31  ;;  %1274 = vpow2.f32 %v1090_v27  ;;  %v1095_v12 = vmul.f32 -1.442695, %v1724_v30  ;;  %v1728_v59 = vadd.f32 %v1689_v63, %v447_v32 }
 0x22e   :  { %v1263_v13 = vpop.eup %1262  ;;  %v1171_v36 = vpop.f32.mrf.mxu0 }
 0x22f   :  { %1276 = vrcp.f32 %v528_v33  ;;  %v526_v5 = vadd.f32 1.0, %v1263_v13  ;;  %v1093_v40 = vmul.f32 -1.442695, %v1728_v59  ;;  %v1732_v28 = vadd.f32 %v1171_v36, %v1689_v63 }
 0x230   :  { %v1265_v14 = vpop.eup %1264  ;;  %1278 = vpow2.f32 %v1095_v12  ;;  %v450_v15 = vpop.f32.mrf.mxu0 }
 0x231   :  { %1280 = vrcp.f32 %v526_v5  ;;  %v529_v43 = vadd.f32 1.0, %v1265_v14  ;;  %v1096_v44 = vmul.f32 -1.442695, %v1732_v28  ;;  %v1736_v6 = vadd.f32 %v1689_v63, %v450_v15 }
 0x232   :  { %v1267_v45 = vpop.eup %1266  ;;  %1282 = vpow2.f32 %v1093_v40  ;;  %v1174_v46 = vpop.f32.mrf.mxu0 }
 0x233   :  { %1284 = vrcp.f32 %v529_v43  ;;  %v527_v23 = vadd.f32 1.0, %v1267_v45  ;;  %v1094_v47 = vmul.f32 -1.442695, %v1736_v6  ;;  %v1740_v50 = vadd.f32 %v1174_v46, %v1689_v63 }
 0x234   :  { %v1269_v51 = vpop.eup %1268  ;;  %1286 = vpow2.f32 %v1096_v44  ;;  %v463_v52 = vpop.f32.mrf.mxu0 }
 0x235   :  { %1288 = vrcp.f32 %v527_v23  ;;  %v1099_v53 = vmul.f32 -1.442695, %v1740_v50  ;;  %v1744_v24 = vadd.f32 %v1689_v63, %v463_v52  ;;  %v532_v34 = vadd.f32 1.0, %v1269_v51 }
 0x236   :  { %v1271_v38 = vpop.eup %1270  ;;  %1290 = vpow2.f32 %v1094_v47  ;;  %v1175_v54 = vpop.f32.mrf.mxu0 }
 0x237   :  { %v530_v55 = vadd.f32 1.0, %v1271_v38  ;;  %v1097_v29 = vmul.f32 -1.442695, %v1744_v24  ;;  %v1748_v56 = vadd.f32 %v1175_v54, %v1689_v63  ;;  %1292 = vpow2.f32 %v1099_v53 }
 0x238   :  { %v1273_v57 = vpop.eup %1272  ;;  %v466_v60 = vpop.f32.mrf.mxu0 }
 0x239   :  { %1294 = vrcp.f32 %v530_v55  ;;  %v1100_v35 = vmul.f32 -1.442695, %v1748_v56  ;;  %v1752_v61 = vadd.f32 %v1689_v63, %v466_v60  ;;  %v533_v62 = vadd.f32 1.0, %v1273_v57 }
 0x23a   :  { %v1275_v41 = vpop.eup %1274  ;;  %1296 = vpow2.f32 %v1097_v29 }
 0x23b   :  { %1298 = vrcp.f32 %v532_v34  ;;  %v531_v0 = vadd.f32 1.0, %v1275_v41  ;;  %v1098_v1 = vmul.f32 -1.442695, %v1752_v61 }
 0x23c   :  { %v1277_v2 = vpop.eup %1276  ;;  %1300 = vpow2.f32 %v1100_v35 }
 0x23d   :  { %v1279_v3 = vpop.eup %1278  ;;  %1302 = vrcp.f32 %v531_v0  ;;  %v1763_v10 = vmul.f32 %v1277_v2, %v1692_v42 }
 0x23e   :  { %v1281_v37 = vpop.eup %1280  ;;  %1304 = vpow2.f32 %v1098_v1  ;;  %v536_v8 = vadd.f32 1.0, %v1279_v3 }
 0x23f   :  { %v1283_v4 = vpop.eup %1282  ;;  %1306 = vrcp.f32 %v533_v62  ;;  %v1756_v7 = vmul.f32 %v1281_v37, %v1696_v11 }
 0x240   :  { %v1285_v63 = vpop.eup %1284  ;;  %v534_v9 = vadd.f32 1.0, %v1283_v4 }
 0x241   :  { %v1287_v18 = vpop.eup %1286  ;;  %590 = vadd.xlane.f32.xlu0 %v1756_v7  ;;  %v1768_v32 = vmul.f32 %v1285_v63, %v1700_v39 }
 0x242   :  { %v1289_v19 = vpop.eup %1288  ;;  %1308 = vrcp.f32 %v534_v9  ;;  %v537_v25 = vadd.f32 1.0, %v1287_v18 }
 0x243   :  { %v1291_v21 = vpop.eup %1290  ;;  %v1760_v22 = vmul.f32 %v1289_v19, %v1704_v48  ;;  %1310 = vrcp.f32 %v536_v8 }
 0x244   :  { %v535_v26 = vadd.f32 1.0, %v1291_v21  ;;  %v1293_v11 = vpop.eup %1292 }
 0x245   :  { %592 = vadd.xlane.f32.xlu1 %v1760_v22  ;;  %594 = vadd.xlane.f32.xlu0 %v1763_v10  ;;  %v540_v42 = vadd.f32 1.0, %v1293_v11 }
 0x246   :  { %v1295_v27 = vpop.eup %1294  ;;  %1312 = vrcp.f32 %v535_v26 }
 0x247   :  { %v1297_v31 = vpop.eup %1296  ;;  %v1771_v48 = vmul.f32 %v1295_v27, %v1712_v20  ;;  %1314 = vrcp.f32 %v537_v25 }
 0x248   :  { %v1299_v33 = vpop.eup %1298  ;;  %v538_v12 = vadd.f32 1.0, %v1297_v31 }
 0x249   :  { %v1301_v13 = vpop.eup %1300  ;;  %596 = vadd.xlane.f32.xlu1 %v1768_v32  ;;  %598 = vadd.xlane.f32.xlu0 %v1771_v48  ;;  %v1779_v39 = vmul.f32 %v1299_v33, %v1708_v16 }
 0x24a   :  { %v1303_v36 = vpop.eup %1302  ;;  %1316 = vrcp.f32 %v538_v12  ;;  %v541_v14 = vadd.f32 1.0, %v1301_v13 }
 0x24b   :  { %v1305_v5 = vpop.eup %1304  ;;  %v1776_v40 = vmul.f32 %v1303_v36, %v1720_v58  ;;  %1318 = vrcp.f32 %v540_v42 }
 0x24c   :  { %v1307_v20 = vpop.eup %1306  ;;  %v539_v15 = vadd.f32 1.0, %v1305_v5  ;;  %v1220_v5 = vld [vmem:[#allocation4 + $0x38] sm:$0xff]  }
 0x24d   :  { %600 = vadd.xlane.f32.xlu1 %v1776_v40  ;;  %602 = vadd.xlane.f32.xlu0 %v1779_v39  ;;  %v1784_v44 = vmul.f32 %v1307_v20, %v1716_v49 }
 0x24e   :  { %1320 = vrcp.f32 %v539_v15  ;;  %1176 = vmatprep.subr.bf16.mxu1 %v1220_v5 }
 0x24f   :  { %v1309_v43 = vpop.eup %1308  ;;  %1322 = vrcp.f32 %v541_v14  ;;  %1177 = vmatpush3.bf16.msra.mxu1 %v1220_v5 }
 0x250   :  { %v1787_v58 = vmul.f32 %v1309_v43, %v1728_v59  ;;  %v1311_v45 = vpop.eup %1310 }
 0x251   :  { %604 = vadd.xlane.f32.xlu1 %v1784_v44  ;;  %v1795_v23 = vmul.f32 %v1311_v45, %v1724_v30 }
 0x252   :  { %606 = vadd.xlane.f32.xlu0 %v1787_v58 }
 0x253   :  { %v1313_v16 = vpop.eup %1312 }
 0x254   :  { %v1792_v46 = vmul.f32 %v1313_v16, %v1736_v6  ;;  %v1315_v47 = vpop.eup %1314  ;;  %v1221_v16 = vld [vmem:[#allocation4 + $0x30] sm:$0xff]  }
 0x255   :  { %v1800_v59 = vmul.f32 %v1315_v47, %v1732_v28  ;;  %1178 = vmatprep.subr.bf16.mxu1 %v1221_v16 }
 0x256   :  { %608 = vadd.xlane.f32.xlu1 %v1792_v46  ;;  %610 = vadd.xlane.f32.xlu0 %v1795_v23 }
 0x257   :  { %v1317_v49 = vpop.eup %1316  ;;  %1179 = vmatpush3.bf16.msra.mxu1 %v1221_v16 }
 0x258   :  { %v1803_v51 = vmul.f32 %v1317_v49, %v1744_v24  ;;  %v1319_v52 = vpop.eup %1318 }
 0x259   :  { %v1811_v53 = vmul.f32 %v1319_v52, %v1740_v50 }
 0x25a   :  { %612 = vadd.xlane.f32.xlu1 %v1800_v59  ;;  %614 = vadd.xlane.f32.xlu0 %v1803_v51 }
 0x25b   :  { %v1321_v6 = vpop.eup %1320 }
 0x25c   :  { %v1808_v30 = vmul.f32 %v1321_v6, %v1752_v61  ;;  %v1323_v38 = vpop.eup %1322 }
 0x25d   :  { %v1816_v28 = vmul.f32 %v1323_v38, %v1748_v56 }
 0x25e   :  { %616 = vadd.xlane.f32.xlu1 %v1808_v30  ;;  %618 = vadd.xlane.f32.xlu0 %v1811_v53 }
 0x262   :  { %620 = vadd.xlane.f32.xlu1 %v1816_v28 }
 0x2ca   :  { %v591_v24 = vpop.xlane.xlu0 %590 }
 0x2cb   :  { %v622_v54 = vmul.f32 0.03125, %v591_v24 }
 0x2cd   :  { %v638_v34 = vsub.f32 %v1756_v7, %v622_v54 }
 0x2ce   :  { %v593_v55 = vpop.xlane.xlu1 %592  ;;  %v595_v29 = vpop.xlane.xlu0 %594 }
 0x2cf   :  { %v623_v57 = vmul.f32 0.03125, %v593_v55  ;;  %v624_v60 = vmul.f32 0.03125, %v595_v29  ;;  %v1822_v50 = vsel %vm48_vm0, %v638_v34, 0.0  ;;  %v1222_v55 = vld [vmem:[#allocation4 + $0x28] sm:$0xff]  }
 0x2d0   :  { %v670_v35 = vmul.f32 %v1822_v50, %v1822_v50  ;;  %1180 = vmatprep.subr.bf16.mxu1 %v1222_v55 }
 0x2d1   :  { %v639_v56 = vsub.f32 %v1760_v22, %v623_v57  ;;  %v640_v61 = vsub.f32 %v1763_v10, %v624_v60  ;;  %1181 = vmatpush3.bf16.msra.mxu1 %v1222_v55 }
 0x2d2   :  { %v597_v41 = vpop.xlane.xlu1 %596  ;;  %686 = vadd.xlane.f32.xlu0 %v670_v35  ;;  %v599_v62 = vpop.xlane.xlu0 %598 }
 0x2d3   :  { %v625_v0 = vmul.f32 0.03125, %v597_v41  ;;  %v626_v1 = vmul.f32 0.03125, %v599_v62  ;;  %v1830_v2 = vsel %vm48_vm0, %v639_v56, 0.0  ;;  %v1834_v3 = vsel %vm48_vm0, %v640_v61, 0.0 }
 0x2d4   :  { %v671_v37 = vmul.f32 %v1830_v2, %v1830_v2  ;;  %v672_v4 = vmul.f32 %v1834_v3, %v1834_v3 }
 0x2d5   :  { %v641_v7 = vsub.f32 %v1768_v32, %v625_v0  ;;  %v642_v63 = vsub.f32 %v1771_v48, %v626_v1  ;;  %v1223_v0 = vld [vmem:[#allocation4 + $0x20] sm:$0xff]  }
 0x2d6   :  { %688 = vadd.xlane.f32.xlu1 %v671_v37  ;;  %v601_v8 = vpop.xlane.xlu1 %600  ;;  %690 = vadd.xlane.f32.xlu0 %v672_v4  ;;  %v603_v9 = vpop.xlane.xlu0 %602 }
 0x2d7   :  { %v627_v18 = vmul.f32 0.03125, %v601_v8  ;;  %v628_v19 = vmul.f32 0.03125, %v603_v9  ;;  %v1844_v21 = vsel %vm48_vm0, %v641_v7, 0.0  ;;  %v1848_v22 = vsel %vm48_vm0, %v642_v63, 0.0  ;;  %1182 = vmatprep.subr.bf16.mxu1 %v1223_v0 }
 0x2d8   :  { %v673_v10 = vmul.f32 %v1844_v21, %v1844_v21  ;;  %v674_v25 = vmul.f32 %v1848_v22, %v1848_v22  ;;  %1183 = vmatpush3.bf16.msra.mxu1 %v1223_v0 }
 0x2d9   :  { %v643_v26 = vsub.f32 %v1776_v40, %v627_v18  ;;  %v644_v11 = vsub.f32 %v1779_v39, %v628_v19 }
 0x2da   :  { %692 = vadd.xlane.f32.xlu1 %v673_v10  ;;  %v605_v27 = vpop.xlane.xlu1 %604  ;;  %694 = vadd.xlane.f32.xlu0 %v674_v25  ;;  %v1225_v25 = vld [vmem:[#allocation4 + $0x10] sm:$0xff]  }
 0x2db   :  { %v629_v31 = vmul.f32 0.03125, %v605_v27  ;;  %v607_v32 = vpop.xlane.xlu0 %606  ;;  %v1858_v48 = vsel %vm48_vm0, %v643_v26, 0.0  ;;  %v1862_v33 = vsel %vm48_vm0, %v644_v11, 0.0  ;;  %v1226_v26 = vld [vmem:[#allocation4 + $0x8] sm:$0xff]   ;;  %v1227_v11 = vld [vmem:[#allocation4] sm:$0xff]  }
 0x2dc   :  { %v630_v42 = vmul.f32 0.03125, %v607_v32  ;;  %v675_v12 = vmul.f32 %v1858_v48, %v1858_v48  ;;  %v676_v13 = vmul.f32 %v1862_v33, %v1862_v33 }
 0x2dd   :  { %v645_v36 = vsub.f32 %v1784_v44, %v629_v31 }
 0x2de   :  { %v646_v40 = vsub.f32 %v1787_v58, %v630_v42  ;;  %696 = vadd.xlane.f32.xlu1 %v675_v12  ;;  %698 = vadd.xlane.f32.xlu0 %v676_v13 }
 0x2df   :  { %v609_v39 = vpop.xlane.xlu1 %608  ;;  %v611_v20 = vpop.xlane.xlu0 %610  ;;  %v1872_v14 = vsel %vm48_vm0, %v645_v36, 0.0 }
 0x2e0   :  { %v631_v15 = vmul.f32 0.03125, %v609_v39  ;;  %v632_v43 = vmul.f32 0.03125, %v611_v20  ;;  %v677_v45 = vmul.f32 %v1872_v14, %v1872_v14  ;;  %v1878_v44 = vsel %vm48_vm0, %v646_v40, 0.0 }
 0x2e1   :  { %v678_v58 = vmul.f32 %v1878_v44, %v1878_v44 }
 0x2e2   :  { %v647_v47 = vsub.f32 %v1792_v46, %v631_v15  ;;  %v648_v49 = vsub.f32 %v1795_v23, %v632_v43  ;;  %700 = vadd.xlane.f32.xlu1 %v677_v45 }
 0x2e3   :  { %v613_v52 = vpop.xlane.xlu1 %612  ;;  %702 = vadd.xlane.f32.xlu0 %v678_v58  ;;  %v615_v6 = vpop.xlane.xlu0 %614 }
 0x2e4   :  { %v633_v38 = vmul.f32 0.03125, %v613_v52  ;;  %v634_v24 = vmul.f32 0.03125, %v615_v6  ;;  %v1886_v54 = vsel %vm48_vm0, %v647_v47, 0.0  ;;  %v1890_v34 = vsel %vm48_vm0, %v648_v49, 0.0 }
 0x2e5   :  { %v679_v46 = vmul.f32 %v1886_v54, %v1886_v54  ;;  %v680_v23 = vmul.f32 %v1890_v34, %v1890_v34 }
 0x2e6   :  { %v649_v29 = vsub.f32 %v1800_v59, %v633_v38  ;;  %v650_v57 = vsub.f32 %v1803_v51, %v634_v24 }
 0x2e7   :  { %704 = vadd.xlane.f32.xlu1 %v679_v46  ;;  %v617_v60 = vpop.xlane.xlu1 %616  ;;  %706 = vadd.xlane.f32.xlu0 %v680_v23  ;;  %v619_v35 = vpop.xlane.xlu0 %618 }
 0x2e8   :  { %v635_v56 = vmul.f32 0.03125, %v617_v60  ;;  %v636_v61 = vmul.f32 0.03125, %v619_v35  ;;  %v1900_v41 = vsel %vm48_vm0, %v649_v29, 0.0  ;;  %v1904_v62 = vsel %vm48_vm0, %v650_v57, 0.0  ;;  %v1934_v29 = vld [vmem:[%s2005_s1 + $0x3] ss:$0 sm:$0xff] }
 0x2e9   :  { %v681_v59 = vmul.f32 %v1900_v41, %v1900_v41  ;;  %v682_v51 = vmul.f32 %v1904_v62, %v1904_v62 }
 0x2ea   :  { %v651_v1 = vsub.f32 %v1808_v30, %v635_v56  ;;  %v652_v37 = vsub.f32 %v1811_v53, %v636_v61  ;;  %v1224_v53 = vld [vmem:[#allocation4 + $0x18] sm:$0xff]  }
 0x2eb   :  { %708 = vadd.xlane.f32.xlu1 %v681_v59  ;;  %v621_v4 = vpop.xlane.xlu1 %620  ;;  %710 = vadd.xlane.f32.xlu0 %v682_v51 }
 0x2ec   :  { %v637_v7 = vmul.f32 0.03125, %v621_v4  ;;  %v1914_v63 = vsel %vm48_vm0, %v651_v1, 0.0  ;;  %v1918_v8 = vsel %vm48_vm0, %v652_v37, 0.0  ;;  %1184 = vmatprep.subr.bf16.mxu1 %v1224_v53  ;;  %v1941_v37 = vld [vmem:[%s2005_s1 + $0x4] ss:$0 sm:$0xff] }
 0x2ed   :  { %v683_v9 = vmul.f32 %v1914_v63, %v1914_v63  ;;  %v684_v30 = vmul.f32 %v1918_v8, %v1918_v8  ;;  %1185 = vmatpush3.bf16.msra.mxu1 %v1224_v53 }
 0x2ee   :  { %v653_v18 = vsub.f32 %v1816_v28, %v637_v7  ;;  %1186 = vmatprep.subr.bf16.mxu1 %v1225_v25 }
 0x2ef   :  { %712 = vadd.xlane.f32.xlu1 %v683_v9  ;;  %714 = vadd.xlane.f32.xlu0 %v684_v30 }
 0x2f0   :  { %v1927_v19 = vsel %vm48_vm0, %v653_v18, 0.0 }
 0x2f1   :  { %v685_v10 = vmul.f32 %v1927_v19, %v1927_v19  ;;  %1187 = vmatpush3.bf16.msra.mxu1 %v1225_v25 }
 0x2f2   :  { %1188 = vmatprep.subr.bf16.mxu1 %v1226_v26 }
 0x2f3   :  { %716 = vadd.xlane.f32.xlu1 %v685_v10 }
 0x2f5   :  { %1189 = vmatpush3.bf16.msra.mxu1 %v1226_v26 }
 0x2f6   :  { %1190 = vmatprep.subr.bf16.mxu1 %v1227_v11 }
 0x2f9   :  { %1191 = vmatpush3.bf16.msra.mxu1 %v1227_v11 }
 0x35b   :  { %v687_v28 = vpop.xlane.xlu0 %686 }
 0x35c   :  { %v718_v27 = vmul.f32 0.03125, %v687_v28 }
 0x35e   :  { %v734_v17 = vadd.f32 1e-05, %v718_v27 }
 0x35f   :  { %v689_v31 = vpop.xlane.xlu1 %688  ;;  %v691_v32 = vpop.xlane.xlu0 %690 }
 0x360   :  { %1324 = vrsqrt.f32 %v734_v17  ;;  %v719_v42 = vmul.f32 0.03125, %v689_v31  ;;  %v720_v12 = vmul.f32 0.03125, %v691_v32 }
 0x362   :  { %v735_v13 = vadd.f32 1e-05, %v719_v42  ;;  %v736_v36 = vadd.f32 1e-05, %v720_v12 }
 0x363   :  { %v693_v5 = vpop.xlane.xlu1 %692  ;;  %v695_v40 = vpop.xlane.xlu0 %694 }
 0x364   :  { %1326 = vrsqrt.f32 %v735_v13  ;;  %v721_v39 = vmul.f32 0.03125, %v693_v5  ;;  %v722_v20 = vmul.f32 0.03125, %v695_v40 }
 0x365   :  { %1328 = vrsqrt.f32 %v736_v36 }
 0x366   :  { %v737_v15 = vadd.f32 1e-05, %v721_v39  ;;  %v738_v43 = vadd.f32 1e-05, %v722_v20 }
 0x367   :  { %v697_v45 = vpop.xlane.xlu1 %696  ;;  %v699_v58 = vpop.xlane.xlu0 %698 }
 0x368   :  { %1330 = vrsqrt.f32 %v737_v15  ;;  %v723_v16 = vmul.f32 0.03125, %v697_v45  ;;  %v724_v47 = vmul.f32 0.03125, %v699_v58 }
 0x369   :  { %1332 = vrsqrt.f32 %v738_v43 }
 0x36a   :  { %v739_v49 = vadd.f32 1e-05, %v723_v16  ;;  %v740_v52 = vadd.f32 1e-05, %v724_v47 }
 0x36b   :  { %v701_v6 = vpop.xlane.xlu1 %700 }
 0x36c   :  { %1334 = vrsqrt.f32 %v739_v49  ;;  %v725_v38 = vmul.f32 0.03125, %v701_v6  ;;  %v703_v24 = vpop.xlane.xlu0 %702 }
 0x36d   :  { %v1325_v46 = vpop.eup %1324  ;;  %1336 = vrsqrt.f32 %v740_v52  ;;  %v726_v23 = vmul.f32 0.03125, %v703_v24 }
 0x36e   :  { %v741_v55 = vadd.f32 1e-05, %v725_v38  ;;  %v766_v57 = vmul.f32 %v1325_v46, %v1822_v50 }
 0x36f   :  { %v742_v60 = vadd.f32 1e-05, %v726_v23 }
 0x370   :  { %1338 = vrsqrt.f32 %v741_v55  ;;  %v705_v35 = vpop.xlane.xlu1 %704  ;;  %v707_v56 = vpop.xlane.xlu0 %706  ;;  %v786_v0 = vmul.f32 %v1934_v29, %v766_v57 }
 0x371   :  { %v1327_v61 = vpop.eup %1326  ;;  %1340 = vrsqrt.f32 %v742_v60  ;;  %v727_v59 = vmul.f32 0.03125, %v705_v35  ;;  %v728_v51 = vmul.f32 0.03125, %v707_v56 }
 0x372   :  { %v1329_v1 = vpop.eup %1328  ;;  %v767_v4 = vmul.f32 %v1327_v61, %v1830_v2  ;;  %v806_v11 = vadd.f32 %v1941_v37, %v786_v0 }
 0x373   :  { %v743_v7 = vadd.f32 1e-05, %v727_v59  ;;  %v744_v50 = vadd.f32 1e-05, %v728_v51  ;;  %v768_v9 = vmul.f32 %v1329_v1, %v1834_v3 }
 0x374   :  { %v709_v30 = vpop.xlane.xlu1 %708  ;;  %v711_v53 = vpop.xlane.xlu0 %710  ;;  %v787_v18 = vmul.f32 %v1934_v29, %v767_v4 }
 0x375   :  { %v1331_v10 = vpop.eup %1330  ;;  %1342 = vrsqrt.f32 %v743_v7  ;;  %v729_v25 = vmul.f32 0.03125, %v709_v30  ;;  %v730_v26 = vmul.f32 0.03125, %v711_v53  ;;  %v788_v17 = vmul.f32 %v1934_v29, %v768_v9 }
 0x376   :  { %v1333_v28 = vpop.eup %1332  ;;  %1344 = vrsqrt.f32 %v744_v50  ;;  %v807_v27 = vadd.f32 %v1941_v37, %v787_v18  ;;  %v769_v2 = vmul.f32 %v1331_v10, %v1844_v21 }
 0x377   :  { %v745_v31 = vadd.f32 1e-05, %v729_v25  ;;  %v746_v3 = vadd.f32 1e-05, %v730_v26  ;;  %v770_v32 = vmul.f32 %v1333_v28, %v1848_v22  ;;  %v808_v21 = vadd.f32 %v1941_v37, %v788_v17 }
 0x378   :  { %v713_v42 = vpop.xlane.xlu1 %712  ;;  %v715_v12 = vpop.xlane.xlu0 %714  ;;  %v822_v13 = vpack.c.bf16 %v807_v27, %v806_v11  ;;  %v789_v36 = vmul.f32 %v1934_v29, %v769_v2 }
 0x379   :  { %v1335_v5 = vpop.eup %1334  ;;  %1346 = vrsqrt.f32 %v745_v31  ;;  %v731_v40 = vmul.f32 0.03125, %v713_v42  ;;  %v732_v39 = vmul.f32 0.03125, %v715_v12  ;;  %v790_v20 = vmul.f32 %v1934_v29, %v770_v32 }
 0x37a   :  { %v1337_v15 = vpop.eup %1336  ;;  %1348 = vrsqrt.f32 %v746_v3  ;;  %1192 = vmatprep.mubr.bf16.mxu1 %v822_v13  ;;  %v809_v43 = vadd.f32 %v1941_v37, %v789_v36  ;;  %v771_v22 = vmul.f32 %v1335_v5, %v1858_v48 }
 0x37b   :  { %v747_v45 = vadd.f32 1e-05, %v731_v40  ;;  %v748_v58 = vadd.f32 1e-05, %v732_v39  ;;  %v772_v16 = vmul.f32 %v1337_v15, %v1862_v33  ;;  %v810_v24 = vadd.f32 %v1941_v37, %v790_v20  ;;  %v1103_v39 = vld [vmem:[%s2005_s1 + $0x5] ss:$0 sm:$0xff] }
 0x37c   :  { %v717_v47 = vpop.xlane.xlu1 %716  ;;  %v823_v49 = vpack.c.bf16 %v809_v43, %v808_v21  ;;  %v791_v52 = vmul.f32 %v1934_v29, %v771_v22  ;;  %v1356_v21 = vld [vmem:[%s2004_s0] sm:$0xff] }
 0x37d   :  { %v1339_v6 = vpop.eup %1338  ;;  %1350 = vrsqrt.f32 %v747_v45  ;;  %v733_v38 = vmul.f32 0.03125, %v717_v47  ;;  %v792_v55 = vmul.f32 %v1934_v29, %v772_v16  ;;  %v1357_v45 = vld [vmem:[%s2004_s0 + $0x8] sm:$0xff] }
 0x37e   :  { %v1341_v46 = vpop.eup %1340  ;;  %1352 = vrsqrt.f32 %v748_v58  ;;  %1193 = vmatmul.mubr.bf16.vlgmr.msra.gmra.mxu1 %v823_v49  ;;  %v811_v23 = vadd.f32 %v1941_v37, %v791_v52  ;;  %v773_v48 = vmul.f32 %v1339_v6, %v1872_v14 }
 0x37f   :  { %v749_v57 = vadd.f32 1e-05, %v733_v38  ;;  %v774_v33 = vmul.f32 %v1341_v46, %v1878_v44  ;;  %v812_v61 = vadd.f32 %v1941_v37, %v792_v55 }
 0x380   :  { %v824_v60 = vpack.c.bf16 %v811_v23, %v810_v24  ;;  %v793_v35 = vmul.f32 %v1934_v29, %v773_v48 }
 0x381   :  { %1354 = vrsqrt.f32 %v749_v57  ;;  %v794_v14 = vmul.f32 %v1934_v29, %v774_v33 }
 0x382   :  { %v1343_v56 = vpop.eup %1342  ;;  %1196 = vmatprep.mubr.bf16.mxu1 %v824_v60  ;;  %v813_v59 = vadd.f32 %v1941_v37, %v793_v35 }
 0x383   :  { %v1345_v51 = vpop.eup %1344  ;;  %v775_v0 = vmul.f32 %v1343_v56, %v1886_v54  ;;  %v814_v9 = vadd.f32 %v1941_v37, %v794_v14 }
 0x384   :  { %v825_v1 = vpack.c.bf16 %v813_v59, %v812_v61  ;;  %v776_v4 = vmul.f32 %v1345_v51, %v1890_v34 }
 0x385   :  { %v795_v44 = vmul.f32 %v1934_v29, %v775_v0 }
 0x386   :  { %v1347_v7 = vpop.eup %1346  ;;  %1197 = vmatmul.mubr.bf16.gmra.mxu1 %v825_v1  ;;  %v796_v18 = vmul.f32 %v1934_v29, %v776_v4 }
 0x387   :  { %v1349_v50 = vpop.eup %1348  ;;  %v815_v30 = vadd.f32 %v1941_v37, %v795_v44  ;;  %v777_v53 = vmul.f32 %v1347_v7, %v1900_v41 }
 0x388   :  { %v778_v54 = vmul.f32 %v1349_v50, %v1904_v62  ;;  %v816_v11 = vadd.f32 %v1941_v37, %v796_v18 }
 0x389   :  { %v826_v10 = vpack.c.bf16 %v815_v30, %v814_v9  ;;  %v797_v25 = vmul.f32 %v1934_v29, %v777_v53 }
 0x38a   :  { %v1351_v26 = vpop.eup %1350  ;;  %v798_v2 = vmul.f32 %v1934_v29, %v778_v54 }
 0x38b   :  { %v1353_v34 = vpop.eup %1352  ;;  %1200 = vmatprep.mubr.bf16.mxu1 %v826_v10  ;;  %v817_v28 = vadd.f32 %v1941_v37, %v797_v25  ;;  %v779_v27 = vmul.f32 %v1351_v26, %v1914_v63 }
 0x38c   :  { %v780_v41 = vmul.f32 %v1353_v34, %v1918_v8  ;;  %v818_v3 = vadd.f32 %v1941_v37, %v798_v2 }
 0x38d   :  { %v827_v17 = vpack.c.bf16 %v817_v28, %v816_v11  ;;  %v799_v31 = vmul.f32 %v1934_v29, %v779_v27 }
 0x38e   :  { %v1355_v62 = vpop.eup %1354  ;;  %v800_v12 = vmul.f32 %v1934_v29, %v780_v41 }
 0x38f   :  { %1201 = vmatmul.mubr.bf16.gmra.mxu1 %v827_v17  ;;  %v819_v32 = vadd.f32 %v1941_v37, %v799_v31  ;;  %v781_v42 = vmul.f32 %v1355_v62, %v1927_v19 }
 0x390   :  { %v820_v36 = vadd.f32 %v1941_v37, %v800_v12 }
 0x391   :  { %v828_v13 = vpack.c.bf16 %v819_v32, %v818_v3  ;;  %v801_v63 = vmul.f32 %v1934_v29, %v781_v42 }
 0x393   :  { %1204 = vmatprep.mubr.bf16.mxu1 %v828_v13  ;;  %v821_v8 = vadd.f32 %v1941_v37, %v801_v63 }
 0x395   :  { %v829_v5 = vpack.c.bf16 %v821_v8, %v820_v36 }
 0x397   :  { %1205 = vmatmul.mubr.bf16.gmra.mxu1 %v829_v5 }
 0x43e   :  { %v1194_v40 = vpop.f32.mrf.mxu1 }
 0x440   :  { %v932_v20 = vpop.f32.mrf.mxu1 }
 0x441   :  { %v933_v15 = vadd.f32 %v1103_v39, %v932_v20 }
 0x442   :  { %v1195_v19 = vpop.f32.mrf.mxu1 }
 0x443   :  { %v995_v29 = vadd.f32 %v1356_v21, %v933_v15 }
 0x444   :  { %v935_v43 = vpop.f32.mrf.mxu1 }
 0x445   :  { %1060 = vst [vmem:[%s2008_s4] sm:$0xff] %v995_v29  ;;  %v936_v37 = vadd.f32 %v1103_v39, %v935_v43 }
 0x446   :  { %v1198_v22 = vpop.f32.mrf.mxu1 }
 0x447   :  { %v996_v58 = vadd.f32 %v1357_v45, %v936_v37 }
 0x448   :  { %v948_v16 = vpop.f32.mrf.mxu1 }
 0x449   :  { %1062 = vst [vmem:[%s2008_s4 + $0x8] sm:$0xff] %v996_v58 }
 0x44a   :  { %v1199_v47 = vpop.f32.mrf.mxu1 }
 0x44c   :  { %v951_v49 = vpop.f32.mrf.mxu1 }
 0x44f   :  { %v1202_v52 = vpop.f32.mrf.mxu1 }
 0x451   :  { %v964_v6 = vpop.f32.mrf.mxu1 }
 0x453   :  { %v1203_v38 = vpop.f32.mrf.mxu1 }
 0x455   :  { %v967_v24 = vpop.f32.mrf.mxu1 }
 0x457   :  { %v1206_v46 = vpop.f32.mrf.mxu1 }
 0x459   :  { %v980_v23 = vpop.f32.mrf.mxu1 }
 0x45b   :  { %v1207_v48 = vpop.f32.mrf.mxu1 }
 0x45d   :  { %v983_v55 = vpop.f32.mrf.mxu1 }
 0x45e   :  { %1068 = vsyncpa [#allocation3], 1 }
 0x45f   :  { %1069 = vsyncpa [#allocation5], 1 }

</bundles_post_ra>
